<compile_context>
chip_gen: v7x
topology: tpu7x:2x2x1
jax: 0.10.0
libtpu: 0.0.40
codegen_flags: <defaults>
</compile_context>

<pallas_src>
import functools

import jax
import jax.numpy as jnp
from jax.experimental import pallas as pl
from jax.experimental.pallas import tpu as pltpu


# ------------------------------- Pallas kernel --------------------------------

def _gmm_kernel(x_ref, w1_ref, b1_ref, w2_ref, b2_ref, w3_ref, b3_ref,
                w4_ref, b4_ref, o_ref, *, k_gmm):
    # fc1: K=2, N=16 -> do it on the VPU (two broadcast MACs) instead of a wasted
    # MXU pass on a (tb, 2) operand.
    x = x_ref[...].astype(jnp.float32)
    w1 = w1_ref[...].astype(jnp.float32)
    h = x[:, 0:1] * w1[0:1, :] + x[:, 1:2] * w1[1:2, :] + b1_ref[...]
    h = jnp.maximum(h, 0.0)

    # fc2 / fc3 / fc4 on the MXU with f32 accumulation.  Operands are cast to the
    # weight dtype (f32 by default, bf16 when use_bf16=True in the wrapper).
    h = jnp.dot(h.astype(w2_ref.dtype), w2_ref[...],
                preferred_element_type=jnp.float32)
    h = jnp.maximum(h + b2_ref[...], 0.0)
    h = jnp.dot(h.astype(w3_ref.dtype), w3_ref[...],
                preferred_element_type=jnp.float32)
    h = jnp.maximum(h + b3_ref[...], 0.0)
    # fc4 (lane-padded to 128 columns; padded columns have zero weight/bias)
    x4 = jnp.dot(h.astype(w4_ref.dtype), w4_ref[...],
                 preferred_element_type=jnp.float32) + b4_ref[...]

    # Heads over the full lane-dense slab, column-masked with selects:
    #   [0, 4k)   : identity (mean, log_std)
    #   [4k, 5k)  : tanh
    #   [5k, 6k)  : log_softmax over exactly those k columns
    col = jax.lax.broadcasted_iota(jnp.int32, x4.shape, 1)
    w_lo, w_hi = 5 * k_gmm, 6 * k_gmm
    w_mask = (col >= w_lo) & (col < w_hi)

    # Row max over the softmax columns only.
    xw = jnp.where(w_mask, x4, -jnp.inf)
    m = jnp.max(xw, axis=1, keepdims=True)

    # Single EUP exp over the slab:
    #   softmax cols -> exp(x4 - m)                  (<= 1, no overflow)
    #   other cols   -> exp(min(2*x4, 30))           (for tanh=(E-1)/(E+1); clamp
    #                                                  keeps E finite -> no NaN)
    arg = jnp.where(w_mask, x4 - m, jnp.minimum(2.0 * x4, 30.0))
    E = jnp.exp(arg)

    # log_softmax columns (select-masked sum; keep the select form — do NOT switch
    # to multiplicative masking).
    e_w = jnp.where(w_mask, E, 0.0)
    lse = m + jnp.log(jnp.sum(e_w, axis=1, keepdims=True))
    log_w = x4 - lse

    # tanh columns: (E - 1) / (E + 1) with approx reciprocal + one Newton step
    # (VPU-only refinement -> ~f32 accuracy, no second EUP transcendental).
    denom = E + 1.0
    r = pl.reciprocal(denom, approx=True)
    r = r * (2.0 - denom * r)
    tanh_v = (E - 1.0) * r

    out = jnp.where(col < 4 * k_gmm, x4,
                    jnp.where(col < w_lo, tanh_v, log_w))
    o_ref[...] = out.astype(o_ref.dtype)


# ------------------------------- JAX wrapper -----------------------------------

def _round_up(x, m):
    return ((x + m - 1) // m) * m


def _choose_tiling(batch, block_rows):
    """Pick (tile_rows, padded_batch, n_tiles).

    * tile_rows is the largest sublane-aligned tile <= block_rows.
    * Whenever the batch allows it we emit >= 2 (and an even number of) grid
      steps so the "parallel" batch axis is sharded across both v7x TensorCores
      (a no-op on single-TC v5e/v6e).
    """
    n_tiles = -(-batch // block_rows)          # ceil div
    if batch > 8:
        n_tiles = max(n_tiles, 2)
    if n_tiles > 1 and n_tiles % 2:
        n_tiles += 1
    tb = _round_up(-(-batch // n_tiles), 8)
    return tb, tb * n_tiles, n_tiles


def gmm_forward(params, data, k_gmm=10, block_rows=1024, use_bf16=False,
                return_padded=False):
    """Fused GMM forward. Returns (mean, log_std, co_eff, log_w).

    block_rows: rows per grid step.  Per-step overhead is ~0.35 us, so bigger is
      better; 1024 keeps the live per-tile VMEM (~6-7 KiB/row) well inside the
      32 MiB limit requested below (safe on v5e/v6e/v7x).
    use_bf16: feed the MXU bf16 operands (f32 accumulation) for fc2/fc3/fc4.
      ~2x fewer MXU passes / half the weight VMEM, at bf16 accuracy.
    return_padded: skip the slicing epilogue and return the (B, 128) lane-padded
      slab for downstream fused consumption.
    """
    B, d_in = data.shape
    out_dim = 6 * k_gmm
    out_pad = _round_up(out_dim, 128)          # lane-dense output slab
    h1, h2 = params["w1"].shape[1], params["w2"].shape[1]
    h3 = params["w3"].shape[1]

    tb, b_pad, _ = _choose_tiling(B, block_rows)
    x = data
    if b_pad != B:
        x = jnp.zeros((b_pad, d_in), data.dtype).at[:B].set(data)

    mxu_dtype = jnp.bfloat16 if use_bf16 else jnp.float32

    # Biases as (1, N) rows (added post-accumulation, kept f32); fc1 weight kept
    # f32 (VPU path); fc2/fc3/fc4 weights pre-cast to the MXU operand dtype;
    # fc4 weight/bias zero-padded to the 128-lane slab.
    b1 = params["b1"].reshape(1, h1).astype(jnp.float32)
    b2 = params["b2"].reshape(1, h2).astype(jnp.float32)
    b3 = params["b3"].reshape(1, h3).astype(jnp.float32)
    w1 = params["w1"].astype(jnp.float32)
    w2 = params["w2"].astype(mxu_dtype)
    w3 = params["w3"].astype(mxu_dtype)
    w4p = jnp.zeros((h3, out_pad), mxu_dtype).at[:, :out_dim].set(
        params["w4"].astype(mxu_dtype))
    b4p = jnp.zeros((1, out_pad), jnp.float32).at[:, :out_dim].set(
        params["b4"].reshape(1, out_dim).astype(jnp.float32))

    kernel = functools.partial(_gmm_kernel, k_gmm=k_gmm)
    out = pl.pallas_call(
        kernel,
        out_shape=jax.ShapeDtypeStruct((b_pad, out_pad), jnp.float32),
        grid_spec=pltpu.PrefetchScalarGridSpec(
            num_scalar_prefetch=0,
            grid=(b_pad // tb,),
            in_specs=[
                pl.BlockSpec((tb, d_in), lambda i: (i, 0)),     # x rows for this tile
                pl.BlockSpec((d_in, h1), lambda i: (0, 0)),     # w1 (resident)
                pl.BlockSpec((1, h1), lambda i: (0, 0)),        # b1
                pl.BlockSpec((h1, h2), lambda i: (0, 0)),       # w2
                pl.BlockSpec((1, h2), lambda i: (0, 0)),        # b2
                pl.BlockSpec((h2, h3), lambda i: (0, 0)),       # w3
                pl.BlockSpec((1, h3), lambda i: (0, 0)),        # b3
                pl.BlockSpec((h3, out_pad), lambda i: (0, 0)),  # w4 (lane-padded)
                pl.BlockSpec((1, out_pad), lambda i: (0, 0)),   # b4 (lane-padded)
            ],
            out_specs=pl.BlockSpec((tb, out_pad), lambda i: (i, 0)),
        ),
        compiler_params=pltpu.CompilerParams(
            dimension_semantics=("parallel",),
            vmem_limit_bytes=32 * 1024 * 1024,   # covers big tiles on v5e's 16 MiB default
        ),
    )(x, w1, b1, w2, b2, w3, b3, w4p, b4p)

    if return_padded:
        return out                              # (b_pad, 128) lane-dense slab

    # Single slice off the padded slab; the four head splits then act on the
    # small (B, 6k) view rather than re-reading the full slab four times.
    out = out[:B, :out_dim]
    mean = out[:, : 2 * k_gmm]
    log_std = out[:, 2 * k_gmm: 4 * k_gmm]
    co_eff = out[:, 4 * k_gmm: 5 * k_gmm]
    log_w = out[:, 5 * k_gmm: 6 * k_gmm]
    return mean, log_std, co_eff, log_w


def gmm_forward_ref(params, data, k_gmm=10):
    """Pure-JAX reference for a silent correctness check."""
    h = jax.nn.relu(data @ params["w1"] + params["b1"])
    h = jax.nn.relu(h @ params["w2"] + params["b2"])
    h = jax.nn.relu(h @ params["w3"] + params["b3"])
    x = h @ params["w4"] + params["b4"]
    mean = x[:, : 2 * k_gmm]
    log_std = x[:, 2 * k_gmm: 4 * k_gmm]
    co_eff = jnp.tanh(x[:, 4 * k_gmm: 5 * k_gmm])
    log_w = jax.nn.log_softmax(x[:, 5 * k_gmm:], axis=1)
    return mean, log_std, co_eff, log_w


def init_params(key, k_gmm=10):
    """Linear layers stored as (in, out) weights + (out,) biases (y = x @ W + b)."""
    def linear(k, fan_in, fan_out):
        kw, kb = jax.random.split(k)
        lim = 1.0 / (fan_in ** 0.5)     # torch.nn.Linear default init range
        w = jax.random.uniform(kw, (fan_in, fan_out), jnp.float32, -lim, lim)
        b = jax.random.uniform(kb, (fan_out,), jnp.float32, -lim, lim)
        return w, b

    ks = jax.random.split(key, 4)
    w1, b1 = linear(ks[0], 2, 16)
    w2, b2 = linear(ks[1], 16, 128)
    w3, b3 = linear(ks[2], 128, 128)
    w4, b4 = linear(ks[3], 128, k_gmm * 6)
    return {"w1": w1, "b1": b1, "w2": w2, "b2": b2,
            "w3": w3, "b3": b3, "w4": w4, "b4": b4}


# ----------------------------------- main ---------------------------------------

if __name__ == "__main__":
    key = jax.random.PRNGKey(0)
    k_data, k_param = jax.random.split(key)

    k_gmm = 10
    batch = 8
    data = jax.random.normal(k_data, (batch, 2), jnp.float32)
    params = init_params(k_param, k_gmm)

    names = ("mean", "log_std", "co_eff", "log_w")
    expected_shapes = ((batch, 2 * k_gmm), (batch, 2 * k_gmm),
                       (batch, k_gmm), (batch, k_gmm))

    refs = jax.block_until_ready(gmm_forward_ref(params, data, k_gmm=k_gmm))

    # Default f32 path: must match the reference to 1e-5.
    fwd = jax.jit(functools.partial(gmm_forward, k_gmm=k_gmm))
    outs = jax.block_until_ready(fwd(params, data))
    for name, o, r, s in zip(names, outs, refs, expected_shapes):
        assert o.shape == s, (name, o.shape, s)
        assert jnp.allclose(o, r, atol=1e-5, rtol=1e-5), name

    # Optional bf16-MXU path: compile + run sanity check at bf16 tolerance.
    fwd_bf16 = jax.jit(functools.partial(gmm_forward, k_gmm=k_gmm, use_bf16=True))
    outs_bf16 = jax.block_until_ready(fwd_bf16(params, data))
    for name, o, r, s in zip(names, outs_bf16, refs, expected_shapes):
        assert o.shape == s, (name, o.shape, s)
        assert bool(jnp.all(jnp.isfinite(o))), name
        assert jnp.allclose(o, r, atol=1e-1, rtol=1e-1), name

    print("KERNEL_OK")
</pallas_src>

<mosaic_0001>
module attributes {stable_mosaic.version = 11 : i64} {
  func.func @_gmm_kernel(%arg0: i32, %arg1: memref<8x2xf32, #tpu.memory_space<vmem>>, %arg2: memref<2x16xf32, #tpu.memory_space<vmem>>, %arg3: memref<1x16xf32, #tpu.memory_space<vmem>>, %arg4: memref<16x128xf32, #tpu.memory_space<vmem>>, %arg5: memref<1x128xf32, #tpu.memory_space<vmem>>, %arg6: memref<128x128xf32, #tpu.memory_space<vmem>>, %arg7: memref<1x128xf32, #tpu.memory_space<vmem>>, %arg8: memref<128x128xf32, #tpu.memory_space<vmem>>, %arg9: memref<1x128xf32, #tpu.memory_space<vmem>>, %arg10: memref<8x128xf32, #tpu.memory_space<vmem>>) attributes {dimension_semantics = [#tpu.dimension_semantics<parallel>], iteration_bounds = array<i64: 1>, scalar_prefetch = 0 : i64, scratch_operands = 0 : i64, tpu.core_type = #tpu.core_type<tc>, window_params = [{transform_indices = @transform_0, window_bounds = array<i64: 8, 2>}, {pipeline_mode = #tpu.pipeline_mode<synchronous>, transform_indices = @transform_1, window_bounds = array<i64: 2, 16>}, {pipeline_mode = #tpu.pipeline_mode<synchronous>, transform_indices = @transform_2, window_bounds = array<i64: 1, 16>}, {pipeline_mode = #tpu.pipeline_mode<synchronous>, transform_indices = @transform_3, window_bounds = array<i64: 16, 128>}, {pipeline_mode = #tpu.pipeline_mode<synchronous>, transform_indices = @transform_4, window_bounds = array<i64: 1, 128>}, {pipeline_mode = #tpu.pipeline_mode<synchronous>, transform_indices = @transform_5, window_bounds = array<i64: 128, 128>}, {pipeline_mode = #tpu.pipeline_mode<synchronous>, transform_indices = @transform_6, window_bounds = array<i64: 1, 128>}, {pipeline_mode = #tpu.pipeline_mode<synchronous>, transform_indices = @transform_7, window_bounds = array<i64: 128, 128>}, {pipeline_mode = #tpu.pipeline_mode<synchronous>, transform_indices = @transform_8, window_bounds = array<i64: 1, 128>}, {transform_indices = @transform_9, window_bounds = array<i64: 8, 128>}]} {
    %c0 = arith.constant 0 : index
    %c0_0 = arith.constant 0 : index
    %0 = vector.load %arg1[%c0, %c0_0] : memref<8x2xf32, #tpu.memory_space<vmem>>, vector<8x2xf32>
    %c0_1 = arith.constant 0 : index
    %c0_2 = arith.constant 0 : index
    %1 = vector.load %arg2[%c0_1, %c0_2] : memref<2x16xf32, #tpu.memory_space<vmem>>, vector<2x16xf32>
    %2 = vector.extract_strided_slice %0 {offsets = [0, 0], sizes = [8, 1], strides = [1, 1]} : vector<8x2xf32> to vector<8x1xf32>
    %3 = vector.extract_strided_slice %1 {offsets = [0, 0], sizes = [1, 16], strides = [1, 1]} : vector<2x16xf32> to vector<1x16xf32>
    %4 = vector.broadcast %2 : vector<8x1xf32> to vector<8x16xf32>
    %5 = vector.broadcast %3 : vector<1x16xf32> to vector<8x16xf32>
    %6 = arith.mulf %4, %5 : vector<8x16xf32>
    %7 = vector.extract_strided_slice %0 {offsets = [0, 1], sizes = [8, 1], strides = [1, 1]} : vector<8x2xf32> to vector<8x1xf32>
    %8 = vector.extract_strided_slice %1 {offsets = [1, 0], sizes = [1, 16], strides = [1, 1]} : vector<2x16xf32> to vector<1x16xf32>
    %9 = vector.broadcast %7 : vector<8x1xf32> to vector<8x16xf32>
    %10 = vector.broadcast %8 : vector<1x16xf32> to vector<8x16xf32>
    %11 = arith.mulf %9, %10 : vector<8x16xf32>
    %12 = arith.addf %6, %11 : vector<8x16xf32>
    %c0_3 = arith.constant 0 : index
    %c0_4 = arith.constant 0 : index
    %13 = vector.load %arg3[%c0_3, %c0_4] : memref<1x16xf32, #tpu.memory_space<vmem>>, vector<1x16xf32>
    %14 = vector.broadcast %13 : vector<1x16xf32> to vector<8x16xf32>
    %15 = arith.addf %12, %14 : vector<8x16xf32>
    %cst = arith.constant 0.000000e+00 : f32
    %16 = vector.broadcast %cst : f32 to vector<8x16xf32>
    %17 = arith.maximumf %15, %16 : vector<8x16xf32>
    %c0_5 = arith.constant 0 : index
    %c0_6 = arith.constant 0 : index
    %18 = vector.load %arg4[%c0_5, %c0_6] : memref<16x128xf32, #tpu.memory_space<vmem>>, vector<16x128xf32>
    %cst_7 = arith.constant dense<0.000000e+00> : vector<8x128xf32>
    %19 = tpu.matmul %17, %18, %cst_7 {dimension_numbers = #tpu.dot_dimension_numbers<[1], [0], [0], [1], [0, 0, 1, 1], [], []>} : vector<8x16xf32>, vector<16x128xf32>, vector<8x128xf32> -> vector<8x128xf32>
    %c0_8 = arith.constant 0 : index
    %c0_9 = arith.constant 0 : index
    %20 = vector.load %arg5[%c0_8, %c0_9] : memref<1x128xf32, #tpu.memory_space<vmem>>, vector<1x128xf32>
    %21 = vector.broadcast %20 : vector<1x128xf32> to vector<8x128xf32>
    %22 = arith.addf %19, %21 : vector<8x128xf32>
    %cst_10 = arith.constant 0.000000e+00 : f32
    %23 = vector.broadcast %cst_10 : f32 to vector<8x128xf32>
    %24 = arith.maximumf %22, %23 : vector<8x128xf32>
    %c0_11 = arith.constant 0 : index
    %c0_12 = arith.constant 0 : index
    %25 = vector.load %arg6[%c0_11, %c0_12] : memref<128x128xf32, #tpu.memory_space<vmem>>, vector<128x128xf32>
    %cst_13 = arith.constant dense<0.000000e+00> : vector<8x128xf32>
    %26 = tpu.matmul %24, %25, %cst_13 {dimension_numbers = #tpu.dot_dimension_numbers<[1], [0], [0], [1], [0, 0, 1, 1], [], []>} : vector<8x128xf32>, vector<128x128xf32>, vector<8x128xf32> -> vector<8x128xf32>
    %c0_14 = arith.constant 0 : index
    %c0_15 = arith.constant 0 : index
    %27 = vector.load %arg7[%c0_14, %c0_15] : memref<1x128xf32, #tpu.memory_space<vmem>>, vector<1x128xf32>
    %28 = vector.broadcast %27 : vector<1x128xf32> to vector<8x128xf32>
    %29 = arith.addf %26, %28 : vector<8x128xf32>
    %cst_16 = arith.constant 0.000000e+00 : f32
    %30 = vector.broadcast %cst_16 : f32 to vector<8x128xf32>
    %31 = arith.maximumf %29, %30 : vector<8x128xf32>
    %c0_17 = arith.constant 0 : index
    %c0_18 = arith.constant 0 : index
    %32 = vector.load %arg8[%c0_17, %c0_18] : memref<128x128xf32, #tpu.memory_space<vmem>>, vector<128x128xf32>
    %cst_19 = arith.constant dense<0.000000e+00> : vector<8x128xf32>
    %33 = tpu.matmul %31, %32, %cst_19 {dimension_numbers = #tpu.dot_dimension_numbers<[1], [0], [0], [1], [0, 0, 1, 1], [], []>} : vector<8x128xf32>, vector<128x128xf32>, vector<8x128xf32> -> vector<8x128xf32>
    %c0_20 = arith.constant 0 : index
    %c0_21 = arith.constant 0 : index
    %34 = vector.load %arg9[%c0_20, %c0_21] : memref<1x128xf32, #tpu.memory_space<vmem>>, vector<1x128xf32>
    %35 = vector.broadcast %34 : vector<1x128xf32> to vector<8x128xf32>
    %36 = arith.addf %33, %35 : vector<8x128xf32>
    %37 = tpu.iota {dimensions = array<i32: 1>} : vector<8x128xi32>
    %c50_i32 = arith.constant 50 : i32
    %38 = vector.broadcast %c50_i32 : i32 to vector<8x128xi32>
    %39 = arith.cmpi sge, %37, %38 : vector<8x128xi32>
    %c60_i32 = arith.constant 60 : i32
    %40 = vector.broadcast %c60_i32 : i32 to vector<8x128xi32>
    %41 = arith.cmpi slt, %37, %40 : vector<8x128xi32>
    %42 = arith.andi %39, %41 : vector<8x128xi1>
    %cst_22 = arith.constant 0xFF800000 : f32
    %43 = vector.broadcast %cst_22 : f32 to vector<8x128xf32>
    %44 = arith.select %42, %36, %43 : vector<8x128xi1>, vector<8x128xf32>
    %cst_23 = arith.constant dense<0xFF800000> : vector<8xf32>
    %45 = vector.multi_reduction <maximumf>, %44, %cst_23 [1] : vector<8x128xf32> to vector<8xf32>
    %46 = vector.shape_cast %45 : vector<8xf32> to vector<8x1xf32>
    %47 = vector.broadcast %46 : vector<8x1xf32> to vector<8x128xf32>
    %48 = arith.subf %36, %47 : vector<8x128xf32>
    %cst_24 = arith.constant 2.000000e+00 : f32
    %49 = vector.broadcast %cst_24 : f32 to vector<8x128xf32>
    %50 = arith.mulf %49, %36 : vector<8x128xf32>
    %cst_25 = arith.constant 3.000000e+01 : f32
    %51 = vector.broadcast %cst_25 : f32 to vector<8x128xf32>
    %52 = arith.minimumf %50, %51 : vector<8x128xf32>
    %53 = arith.select %42, %48, %52 : vector<8x128xi1>, vector<8x128xf32>
    %54 = math.exp %53 : vector<8x128xf32>
    %cst_26 = arith.constant 0.000000e+00 : f32
    %55 = vector.broadcast %cst_26 : f32 to vector<8x128xf32>
    %56 = arith.select %42, %54, %55 : vector<8x128xi1>, vector<8x128xf32>
    %cst_27 = arith.constant dense<0.000000e+00> : vector<8xf32>
    %57 = vector.multi_reduction <add>, %56, %cst_27 [1] : vector<8x128xf32> to vector<8xf32>
    %58 = vector.shape_cast %57 : vector<8xf32> to vector<8x1xf32>
    %59 = math.log %58 : vector<8x1xf32>
    %60 = arith.addf %46, %59 : vector<8x1xf32>
    %61 = vector.broadcast %60 : vector<8x1xf32> to vector<8x128xf32>
    %62 = arith.subf %36, %61 : vector<8x128xf32>
    %cst_28 = arith.constant 1.000000e+00 : f32
    %63 = vector.broadcast %cst_28 : f32 to vector<8x128xf32>
    %64 = arith.addf %54, %63 : vector<8x128xf32>
    %65 = tpu.reciprocal %64 {approx = true} : vector<8x128xf32> -> vector<8x128xf32>
    %66 = arith.mulf %64, %65 : vector<8x128xf32>
    %cst_29 = arith.constant 2.000000e+00 : f32
    %67 = vector.broadcast %cst_29 : f32 to vector<8x128xf32>
    %68 = arith.subf %67, %66 : vector<8x128xf32>
    %69 = arith.mulf %65, %68 : vector<8x128xf32>
    %cst_30 = arith.constant 1.000000e+00 : f32
    %70 = vector.broadcast %cst_30 : f32 to vector<8x128xf32>
    %71 = arith.subf %54, %70 : vector<8x128xf32>
    %72 = arith.mulf %71, %69 : vector<8x128xf32>
    %c40_i32 = arith.constant 40 : i32
    %73 = vector.broadcast %c40_i32 : i32 to vector<8x128xi32>
    %74 = arith.cmpi slt, %37, %73 : vector<8x128xi32>
    %c50_i32_31 = arith.constant 50 : i32
    %75 = vector.broadcast %c50_i32_31 : i32 to vector<8x128xi32>
    %76 = arith.cmpi slt, %37, %75 : vector<8x128xi32>
    %77 = arith.select %76, %72, %62 : vector<8x128xi1>, vector<8x128xf32>
    %78 = arith.select %74, %36, %77 : vector<8x128xi1>, vector<8x128xf32>
    %c0_32 = arith.constant 0 : index
    %c0_33 = arith.constant 0 : index
    %79 = vector.load %arg10[%c0_32, %c0_33] : memref<8x128xf32, #tpu.memory_space<vmem>>, vector<8x128xf32>
    tpu.vector_store %arg10[%c0_32, %c0_33], %78 {strides = array<i32>} : memref<8x128xf32, #tpu.memory_space<vmem>>, vector<8x128xf32>,
    return
  }
  func.func @transform_0(%arg0: i32) -> (i32, i32) {
    %c0_i32 = arith.constant 0 : i32
    %c0_i32_0 = arith.constant 0 : i32
    return %arg0, %c0_i32 : i32, i32
  }
  func.func @transform_1(%arg0: i32) -> (i32, i32) {
    %c0_i32 = arith.constant 0 : i32
    %c0_i32_0 = arith.constant 0 : i32
    %c0_i32_1 = arith.constant 0 : i32
    return %c0_i32, %c0_i32_0 : i32, i32
  }
  func.func @transform_2(%arg0: i32) -> (i32, i32) {
    %c0_i32 = arith.constant 0 : i32
    %c0_i32_0 = arith.constant 0 : i32
    %c0_i32_1 = arith.constant 0 : i32
    return %c0_i32, %c0_i32_0 : i32, i32
  }
  func.func @transform_3(%arg0: i32) -> (i32, i32) {
    %c0_i32 = arith.constant 0 : i32
    %c0_i32_0 = arith.constant 0 : i32
    %c0_i32_1 = arith.constant 0 : i32
    return %c0_i32, %c0_i32_0 : i32, i32
  }
  func.func @transform_4(%arg0: i32) -> (i32, i32) {
    %c0_i32 = arith.constant 0 : i32
    %c0_i32_0 = arith.constant 0 : i32
    %c0_i32_1 = arith.constant 0 : i32
    return %c0_i32, %c0_i32_0 : i32, i32
  }
  func.func @transform_5(%arg0: i32) -> (i32, i32) {
    %c0_i32 = arith.constant 0 : i32
    %c0_i32_0 = arith.constant 0 : i32
    %c0_i32_1 = arith.constant 0 : i32
    return %c0_i32, %c0_i32_0 : i32, i32
  }
  func.func @transform_6(%arg0: i32) -> (i32, i32) {
    %c0_i32 = arith.constant 0 : i32
    %c0_i32_0 = arith.constant 0 : i32
    %c0_i32_1 = arith.constant 0 : i32
    return %c0_i32, %c0_i32_0 : i32, i32
  }
  func.func @transform_7(%arg0: i32) -> (i32, i32) {
    %c0_i32 = arith.constant 0 : i32
    %c0_i32_0 = arith.constant 0 : i32
    %c0_i32_1 = arith.constant 0 : i32
    return %c0_i32, %c0_i32_0 : i32, i32
  }
  func.func @transform_8(%arg0: i32) -> (i32, i32) {
    %c0_i32 = arith.constant 0 : i32
    %c0_i32_0 = arith.constant 0 : i32
    %c0_i32_1 = arith.constant 0 : i32
    return %c0_i32, %c0_i32_0 : i32, i32
  }
  func.func @transform_9(%arg0: i32) -> (i32, i32) {
    %c0_i32 = arith.constant 0 : i32
    %c0_i32_0 = arith.constant 0 : i32
    return %arg0, %c0_i32 : i32, i32
  }
}

</mosaic_0001>

<bundles_post_ra>
// kernel: gmm_forward.1
= control target key start
LH: loop header
LB: loop body
LE: loop exit
PB: predicated region body
PF: predicated region fallthrough
CT: control target
= control target key end

     0   :  { %v555_v0 = vmov 0   ;;  %v556_v2 = vmov 1   ;;  %v557_v6 = vmov 0.0|0.0   ;;  %vm558_vm0 = vmmov 0   ;;  %s755_s0 = inlined_call_operand.vmem [shape: f32[8,2], index: 0, kind: input, shape index: {}]   ;;  %s756_s3 = inlined_call_operand.vmem [shape: f32[16,128], index: 3, kind: input, shape index: {}]   ;;  %s757_s5 = inlined_call_operand.vmem [shape: f32[128,128], index: 5, kind: input, shape index: {}]   ;;  %s758_s1 = inlined_call_operand.vmem [shape: f32[2,16], index: 1, kind: input, shape index: {}]   ;;  %s759_s2 = inlined_call_operand.vmem [shape: f32[1,16], index: 2, kind: input, shape index: {}]   ;;  %s760_s7 = inlined_call_operand.vmem [shape: f32[128,128], index: 7, kind: input, shape index: {}]   ;;  %s761_s4 = inlined_call_operand.vmem [shape: f32[1,128], index: 4, kind: input, shape index: {}]   ;;  %s762_s6 = inlined_call_operand.vmem [shape: f32[1,128], index: 6, kind: input, shape index: {}]   ;;  %s763_s8 = inlined_call_operand.vmem [shape: f32[1,128], index: 8, kind: input, shape index: {}]   ;;  %s764_s9 = inlined_call_operand.vmem [shape: f32[8,128], index: 9, kind: output, shape index: {}]  }
   0x1   :  { %547 = vset.pattern.permute.xlu0 %v555_v0  ;;  %v32_v1 = vld [vmem:[%s755_s0] sm:$0xff]  ;;  %v64_v4 = vld [vmem:[%s756_s3 + $0x8] sm:$0xff]  ;;  %491 = vmatprep.subr.bf16.mxu0 %v557_v6  ;;  %v559_v7 = vmov 0.0   ;;  %v149_v10 = vld [vmem:[%s757_s5 + $0x10] sm:$0xff]  ;;  %v39_v29 = vlaneseq  ;;  %vm72_vm1 = vcmask 130048  }
   0x2   :  { %36 = vperm.xlu0 %547, %v32_v1   ;;  %v63_v3 = vld [vmem:[%s756_s3] sm:$0xff]  ;;  %494 = vmatprep.subr.bf16.mxu1 %v557_v6  ;;  %v148_v9 = vld [vmem:[%s757_s5 + $0x8] sm:$0xff]  ;;  %v150_v12 = vld [vmem:[%s757_s5 + $0x18] sm:$0xff] }
   0x3   :  { %v492_v5 = vpack.c.bf16 %v64_v4, %v63_v3  ;;  %418 = vmatprep.mubr.msk.f32.mxu0 %vm558_vm0, %v559_v7  ;;  %453 = vmatprep.mubr.msk.f32.mxu1 %vm558_vm0, %v559_v7  ;;  %v147_v8 = vld [vmem:[%s757_s5] sm:$0xff]  ;;  %v498_v13 = vpack.c.bf16 %v150_v12, %v149_v10  ;;  %v152_v15 = vld [vmem:[%s757_s5 + $0x28] sm:$0xff]  ;;  %v153_v17 = vld [vmem:[%s757_s5 + $0x30] sm:$0xff]  ;;  %v40_v30 = vshrl.u32 %v39_v29, 7 }
   0x4   :  { %v495_v11 = vpack.c.bf16 %v148_v9, %v147_v8  ;;  %v151_v14 = vld [vmem:[%s757_s5 + $0x20] sm:$0xff]  ;;  %v154_v18 = vld [vmem:[%s757_s5 + $0x38] sm:$0xff]  ;;  %v156_v21 = vld [vmem:[%s757_s5 + $0x48] sm:$0xff] }
   0x5   :  { %493 = vmatpush3.bf16.msra.mxu0 %v492_v5  ;;  %v501_v16 = vpack.c.bf16 %v152_v15, %v151_v14  ;;  %v504_v19 = vpack.c.bf16 %v154_v18, %v153_v17  ;;  %v155_v20 = vld [vmem:[%s757_s5 + $0x40] sm:$0xff]  ;;  %v157_v23 = vld [vmem:[%s757_s5 + $0x50] sm:$0xff]  ;;  %v158_v24 = vld [vmem:[%s757_s5 + $0x58] sm:$0xff]  ;;  %v41_v31 = vsub.s32 0, %v40_v30  ;;  %v50_v32 = vsub.s32 1, %v40_v30 }
   0x6   :  { %548 = vset.pattern.permute.xlu0 %v556_v2  ;;  %518 = vmatprep.subr.bf16.mxu0 %v557_v6  ;;  %v507_v22 = vpack.c.bf16 %v156_v21, %v155_v20  ;;  %v510_v25 = vpack.c.bf16 %v158_v24, %v157_v23  ;;  %v159_v26 = vld [vmem:[%s757_s5 + $0x60] sm:$0xff]  ;;  %v160_v27 = vld [vmem:[%s757_s5 + $0x68] sm:$0xff]  ;;  %v161_v44 = vld [vmem:[%s757_s5 + $0x70] sm:$0xff]  ;;  %v335_v17 = vand.u32 127, %v39_v29 }
   0x7   :  { %45 = vperm.xlu0 %548, %v32_v1   ;;  %496 = vmatpush3.bf16.msra.mxu1 %v495_v11  ;;  %v513_v28 = vpack.c.bf16 %v160_v27, %v159_v26  ;;  %v33_v33 = vld [vmem:[%s758_s1] sm:$0x3]  ;;  %v162_v45 = vld [vmem:[%s757_s5 + $0x78] sm:$0xff]  ;;  %v242_v48 = vld [vmem:[%s760_s7 + $0x8] sm:$0xff] }
   0x8   :  { %497 = vmatprep.subr.bf16.mxu1 %v557_v6  ;;  %v42_v35 = vrot.slane %v33_v33, %v41_v31  ;;  %v51_v36 = vrot.slane %v33_v33, %v50_v32  ;;  %v371_v40 = vld [vmem:[%s759_s2] ss:$0 sm:$0xff]  ;;  %v516_v46 = vpack.c.bf16 %v162_v45, %v161_v44  ;;  %v243_v49 = vld [vmem:[%s760_s7 + $0x10] sm:$0xff]  ;;  %v244_v51 = vld [vmem:[%s760_s7 + $0x18] sm:$0xff]  ;;  %vm336_vm2 = vcmp.ge.s32.totalorder %v335_v17, 50 }
   0x9   :  { %v241_v47 = vld [vmem:[%s760_s7] sm:$0xff]  ;;  %v522_v52 = vpack.c.bf16 %v244_v51, %v243_v49  ;;  %v246_v54 = vld [vmem:[%s760_s7 + $0x28] sm:$0xff]  ;;  %v247_v56 = vld [vmem:[%s760_s7 + $0x30] sm:$0xff]  ;;  %vm337_vm3 = vcmp.lt.s32.totalorder %v335_v17, 60  ;;  %vm363_vm5 = vcmp.lt.s32.totalorder %v335_v17, 50  ;;  %vm362_vm6 = vcmp.lt.s32.totalorder %v335_v17, 40 }
   0xa   :  { %v519_v50 = vpack.c.bf16 %v242_v48, %v241_v47  ;;  %v245_v53 = vld [vmem:[%s760_s7 + $0x20] sm:$0xff]  ;;  %v248_v57 = vld [vmem:[%s760_s7 + $0x38] sm:$0xff]  ;;  %v250_v60 = vld [vmem:[%s760_s7 + $0x48] sm:$0xff] }
   0xb   :  { %499 = vmatpush3.bf16.msra.mxu1 %v498_v13  ;;  %v525_v55 = vpack.c.bf16 %v246_v54, %v245_v53  ;;  %v528_v58 = vpack.c.bf16 %v248_v57, %v247_v56  ;;  %v249_v59 = vld [vmem:[%s760_s7 + $0x40] sm:$0xff]  ;;  %v251_v62 = vld [vmem:[%s760_s7 + $0x50] sm:$0xff]  ;;  %v252_v63 = vld [vmem:[%s760_s7 + $0x58] sm:$0xff] }
   0xc   :  { %500 = vmatprep.subr.bf16.mxu1 %v557_v6  ;;  %v531_v61 = vpack.c.bf16 %v250_v60, %v249_v59  ;;  %v534_v0 = vpack.c.bf16 %v252_v63, %v251_v62  ;;  %v253_v1 = vld [vmem:[%s760_s7 + $0x60] sm:$0xff]  ;;  %v254_v2 = vld [vmem:[%s760_s7 + $0x68] sm:$0xff]  ;;  %v255_v10 = vld [vmem:[%s760_s7 + $0x70] sm:$0xff] }
   0xd   :  { %v537_v3 = vpack.c.bf16 %v254_v2, %v253_v1  ;;  %v372_v4 = vld [vmem:[%s761_s4] ss:$0 sm:$0xff]  ;;  %v256_v11 = vld [vmem:[%s760_s7 + $0x78] sm:$0xff]  ;;  %vm338_vm4 = vmand %vm336_vm2, %vm337_vm3 }
   0xe   :  { %v540_v12 = vpack.c.bf16 %v256_v11, %v255_v10  ;;  %v375_v18 = vld [vmem:[%s763_s8] ss:$0 sm:$0xff] }
   0xf   :  { %502 = vmatpush3.bf16.msra.mxu1 %v501_v16 }
  0x10   :  { %503 = vmatprep.subr.bf16.mxu1 %v557_v6 }
  0x13   :  { %505 = vmatpush3.bf16.msra.mxu1 %v504_v19 }
  0x14   :  { %506 = vmatprep.subr.bf16.mxu1 %v557_v6 }
  0x17   :  { %508 = vmatpush3.bf16.msra.mxu1 %v507_v22 }
  0x18   :  { %509 = vmatprep.subr.bf16.mxu1 %v557_v6 }
  0x1b   :  { %511 = vmatpush3.bf16.msra.mxu1 %v510_v25 }
  0x1c   :  { %512 = vmatprep.subr.bf16.mxu1 %v557_v6 }
  0x1f   :  { %514 = vmatpush3.bf16.msra.mxu1 %v513_v28 }
  0x20   :  { %515 = vmatprep.subr.bf16.mxu1 %v557_v6 }
  0x23   :  { %517 = vmatpush3.bf16.msra.mxu1 %v516_v46 }
  0x81   :  { %v37_v34 = vpop.permute.xlu0 %36 }
  0x82   :  { %v43_v38 = vmul.f32 %v42_v35, %v37_v34 }
  0x86   :  { %v46_v37 = vpop.permute.xlu0 %45 }
  0x87   :  { %v52_v39 = vmul.f32 %v51_v36, %v46_v37 }
  0x89   :  { %v53_v41 = vadd.f32 %v52_v39, %v43_v38 }
  0x8b   :  { %v61_v42 = vadd.f32 %v371_v40, %v53_v41 }
  0x8d   :  { %v62_v43 = vmax.f32 %v61_v42, 0.0 }
  0x8f   :  { %419 = vmatmul.mubr.msk.f32.vlgmr.msra.gmra.mrb[0].mxu0 %vm72_vm1, %v62_v43 }
  0x90   :  { %488 = vmatprep.mubr.msk.f32.mxu0 %vm558_vm0, %v559_v7  ;;  %520 = vmatpush3.bf16.msra.mxu0 %v519_v50 }
  0x91   :  { %521 = vmatprep.subr.bf16.mxu0 %v557_v6 }
  0x94   :  { %523 = vmatpush3.bf16.msra.mxu0 %v522_v52 }
  0x95   :  { %524 = vmatprep.subr.bf16.mxu0 %v557_v6 }
  0x98   :  { %526 = vmatpush3.bf16.msra.mxu0 %v525_v55 }
  0x99   :  { %527 = vmatprep.subr.bf16.mxu0 %v557_v6 }
  0x9c   :  { %529 = vmatpush3.bf16.msra.mxu0 %v528_v58 }
  0x9d   :  { %530 = vmatprep.subr.bf16.mxu0 %v557_v6 }
  0xa0   :  { %532 = vmatpush3.bf16.msra.mxu0 %v531_v61 }
  0xa1   :  { %533 = vmatprep.subr.bf16.mxu0 %v557_v6 }
  0xa4   :  { %535 = vmatpush3.bf16.msra.mxu0 %v534_v0 }
  0xa5   :  { %536 = vmatprep.subr.bf16.mxu0 %v557_v6 }
  0xa8   :  { %538 = vmatpush3.bf16.msra.mxu0 %v537_v3 }
  0xa9   :  { %539 = vmatprep.subr.bf16.mxu0 %v557_v6  ;;  %v374_v6 = vld [vmem:[%s762_s6] ss:$0 sm:$0xff] }
  0xac   :  { %541 = vmatpush3.bf16.msra.mxu0 %v540_v12 }
 0x162   :  { %v142_v5 = vpop.f32.mrb[0].mxu0 }
 0x163   :  { %v143_v7 = vadd.f32 %v372_v4, %v142_v5  ;;  %v420_v8 = vpop.f32.mrb[1].mxu0 }
 0x165   :  { %v146_v9 = vmax.f32 %v143_v7, 0.0 }
 0x167   :  { %454 = vmatmul.mubr.f32.vlgmr.msra.gmra.mrb[0].mxu1 %v146_v9 }
 0x23a   :  { %v236_v13 = vpop.f32.mrb[0].mxu1 }
 0x23b   :  { %v237_v14 = vadd.f32 %v374_v6, %v236_v13  ;;  %v455_v15 = vpop.f32.mrb[1].mxu1 }
 0x23d   :  { %v240_v16 = vmax.f32 %v237_v14, 0.0 }
 0x23f   :  { %489 = vmatmul.mubr.f32.vlgmr.msra.gmra.mrb[2].mxu0 %v240_v16 }
 0x312   :  { %v330_v19 = vpop.f32.mrb[2].mxu0 }
 0x313   :  { %v331_v20 = vadd.f32 %v375_v18, %v330_v19  ;;  %v490_v21 = vpop.f32.mrb[3].mxu0 }
 0x315   :  { %v339_v22 = vsel %vm338_vm4, %v331_v20, -inf  ;;  %v343_v23 = vmul.f32 2.0, %v331_v20 }
 0x316   :  { %340 = vmax.xlane.f32.xlu1 %v339_v22 }
 0x317   :  { %v344_v25 = vmin.f32 %v343_v23, 30.0 }
 0x3a3   :  { %v341_v24 = vpop.xlane.xlu1 %340 }
 0x3a4   :  { %v342_v26 = vsub.f32 %v331_v20, %v341_v24 }
 0x3a6   :  { %v345_v27 = vsel %vm338_vm4, %v342_v26, %v344_v25 }
 0x3a7   :  { %v346_v28 = vmul.f32 1.442695, %v345_v27 }
 0x3a9   :  { %549 = vpow2.f32 %v346_v28 }
 0x3b3   :  { %v550_v29 = vpop.eup %549 }
 0x3b4   :  { %v348_v30 = vsel %vm338_vm4, %v550_v29, 0.0  ;;  %v355_v31 = vadd.f32 1.0, %v550_v29  ;;  %v376_v39 = vadd.f32 -1.0, %v550_v29 }
 0x3b5   :  { %349 = vadd.xlane.f32.xlu1 %v348_v30 }
 0x3b6   :  { %551 = vrcp.f32 %v355_v31 }
 0x3c0   :  { %v552_v33 = vpop.eup %551 }
 0x3c1   :  { %v357_v34 = vmul.f32 %v552_v33, %v355_v31 }
 0x3c3   :  { %v358_v35 = vsub.f32 2.0, %v357_v34 }
 0x3c5   :  { %v359_v37 = vmul.f32 %v552_v33, %v358_v35 }
 0x3c7   :  { %v361_v41 = vmul.f32 %v376_v39, %v359_v37 }
 0x442   :  { %v350_v32 = vpop.xlane.xlu1 %349 }
 0x443   :  { %553 = vlog2.f32 %v350_v32 }
 0x44d   :  { %v554_v36 = vpop.eup %553 }
 0x44e   :  { %v352_v38 = vmul.f32 0.6931472, %v554_v36 }
 0x450   :  { %v353_v40 = vadd.f32 %v352_v38, %v341_v24 }
 0x452   :  { %v354_v42 = vsub.f32 %v331_v20, %v353_v40 }
 0x454   :  { %v364_v43 = vsel %vm363_vm5, %v361_v41, %v354_v42 }
 0x455   :  { %v365_v44 = vsel %vm362_vm6, %v331_v20, %v364_v43 }
 0x456   :  { %366 = vst [vmem:[%s764_s9] sm:$0xff] %v365_v44 }

</bundles_post_ra>
